<compile_context>
chip_gen: v6e
topology: v6e:2x2x1
jax: 0.10.0
libtpu: 0.0.40
codegen_flags: <defaults>
</compile_context>

<pallas_src>
import functools
import math

import jax
import jax.numpy as jnp
from jax.experimental import pallas as pl
from jax.experimental.pallas import tpu as pltpu

LINEAR_SIZE = 256
CLIP_REWARD_BOUNTY_OVER_SUBPOLICY = "each"   # {'each': before_deconv, 'all': conved}
LANE = 128
TILE_B = 128


def _round_up(n, m):
    return ((n + m - 1) // m) * m


def _transition_kernel(x_ref, a_ref,
                       w1_ref, b1_ref, w2_ref, b2_ref,
                       wa_ref, ba_ref, wr_ref, br_ref,
                       wd1_ref, bd1_ref, wd2_ref, bd2_ref,
                       pred_ref, reward_ref, *, clip_each):
    # encoder ("conv" for vector states): Linear -> Tanh -> Linear -> Tanh
    h1 = jnp.tanh(
        jnp.dot(x_ref[...], w1_ref[...],
                preferred_element_type=jnp.float32) + b1_ref[...])
    conved = jnp.tanh(
        jnp.dot(h1.astype(jnp.bfloat16), w2_ref[...],
                preferred_element_type=jnp.float32) + b2_ref[...])
    # input_action_linear: Linear(action_n -> linear_size)
    act_emb = (jnp.dot(a_ref[...], wa_ref[...],
                       preferred_element_type=jnp.float32) + ba_ref[...])
    before_deconv = conved * act_emb
    # reward_bounty_linear head: N=1 matmul replaced by VPU multiply + lane reduce
    rb_in = before_deconv if clip_each else conved
    rb = jnp.sum(rb_in * wr_ref[...], axis=-1, keepdims=True) + br_ref[...]
    reward_ref[...] = jnp.broadcast_to(rb, reward_ref.shape)   # lane-dense store
    # deconv (vector): Linear -> Tanh -> Linear   (Explore2D: no output activation)
    d1 = jnp.tanh(
        jnp.dot(before_deconv.astype(jnp.bfloat16), wd1_ref[...],
                preferred_element_type=jnp.float32) + bd1_ref[...])
    pred_ref[...] = (jnp.dot(d1.astype(jnp.bfloat16), wd2_ref[...],
                             preferred_element_type=jnp.float32) + bd2_ref[...])


def transition_model_forward(x, action_onehot, params, output_observation_shape,
                             *, tile_b=TILE_B):
    """x: (B, obs_flat) f32; action_onehot: (B, action_n) f32."""
    B, obs_flat = x.shape
    action_n = action_onehot.shape[1]
    obs_out = math.prod(output_observation_shape)

    obs_in_pad = _round_up(obs_flat, LANE)
    act_pad = _round_up(action_n, LANE)
    obs_out_pad = _round_up(obs_out, LANE)
    # Adaptive batch tile: sublane-aligned (8), capped at MXU-friendly 128.
    tile_b = max(8, min(tile_b, _round_up(B, 8)))
    b_pad = _round_up(B, tile_b)
    num_tiles = b_pad // tile_b

    # --- zero-pad activations to lane-aligned bf16 slabs (paid once in XLA) ---
    x_p = jnp.zeros((b_pad, obs_in_pad), jnp.bfloat16).at[:B, :obs_flat].set(
        x.astype(jnp.bfloat16))
    a_p = jnp.zeros((b_pad, act_pad), jnp.bfloat16).at[:B, :action_n].set(
        action_onehot.astype(jnp.bfloat16))

    # --- pad / cast weights: MXU inputs bf16, biases + reward row stay f32 ---
    w1 = jnp.zeros((obs_in_pad, LINEAR_SIZE), jnp.bfloat16).at[:obs_flat, :].set(
        params["w1"].astype(jnp.bfloat16))
    w2 = params["w2"].astype(jnp.bfloat16)
    wa = jnp.zeros((act_pad, LINEAR_SIZE), jnp.bfloat16).at[:action_n, :].set(
        params["wa"].astype(jnp.bfloat16))
    wd1 = params["wd1"].astype(jnp.bfloat16)
    wd2 = jnp.zeros((LINEAR_SIZE, obs_out_pad), jnp.bfloat16).at[:, :obs_out].set(
        params["wd2"].astype(jnp.bfloat16))
    b1, b2, ba, bd1 = params["b1"], params["b2"], params["ba"], params["bd1"]
    bd2 = jnp.zeros((1, obs_out_pad), jnp.float32).at[:, :obs_out].set(params["bd2"])
    wr = params["wr"].reshape(1, LINEAR_SIZE)   # (256,1) -> row for the VPU reduction
    br = params["br"].reshape(1, 1)

    # --- BlockSpecs ---
    def batch_spec(cols):
        return pl.BlockSpec((tile_b, cols), lambda i: (i, 0))

    def resident(arr):  # whole array, constant block index -> stays VMEM-resident
        return pl.BlockSpec(arr.shape, lambda i: (0, 0))

    in_specs = [
        batch_spec(obs_in_pad), batch_spec(act_pad),
        resident(w1), resident(b1), resident(w2), resident(b2),
        resident(wa), resident(ba), resident(wr), resident(br),
        resident(wd1), resident(bd1), resident(wd2), resident(bd2),
    ]
    out_specs = (
        pl.BlockSpec((tile_b, obs_out_pad), lambda i: (i, 0)),
        pl.BlockSpec((tile_b, LANE), lambda i: (i, 0)),
    )
    out_shape = (
        jax.ShapeDtypeStruct((b_pad, obs_out_pad), jnp.float32),  # predicted_state
        jax.ShapeDtypeStruct((b_pad, LANE), jnp.float32),         # reward (lane-dense)
    )

    # --- advisory cost estimate ---
    flops = 2 * b_pad * (obs_in_pad * LINEAR_SIZE + 2 * LINEAR_SIZE * LINEAR_SIZE
                         + act_pad * LINEAR_SIZE + LINEAR_SIZE * obs_out_pad
                         + LINEAR_SIZE)
    transcendentals = 3 * b_pad * LINEAR_SIZE
    weight_bytes = 2 * (w1.size + w2.size + wa.size + wd1.size + wd2.size)
    bias_bytes = 4 * (b1.size + b2.size + ba.size + bd1.size + bd2.size
                      + wr.size + br.size)
    act_bytes = (2 * b_pad * (obs_in_pad + act_pad)
                 + 4 * b_pad * (obs_out_pad + LANE))
    cost = pl.CostEstimate(flops=flops, transcendentals=transcendentals,
                           bytes_accessed=weight_bytes + bias_bytes + act_bytes)

    pred_pad, reward_pad = pl.pallas_call(
        functools.partial(
            _transition_kernel,
            clip_each=(CLIP_REWARD_BOUNTY_OVER_SUBPOLICY == "each")),
        out_shape=out_shape,
        grid=(num_tiles,),
        in_specs=in_specs,
        out_specs=out_specs,
        compiler_params=pltpu.CompilerParams(
            dimension_semantics=("parallel",)),
        cost_estimate=cost,
    )(x_p, a_p, w1, b1, w2, b2, wa, ba, wr, br, wd1, bd1, wd2, bd2)

    predicted_state = pred_pad[:B, :obs_out].reshape(
        (B,) + tuple(output_observation_shape))
    predicted_reward = reward_pad[:B, 0:1]
    return predicted_state, predicted_reward


def init_params(key, obs_flat, action_n, linear_size):
    """Deterministic synthetic init (scaled normal weights, zero biases)."""
    ks = jax.random.split(key, 6)

    def lin(k, n_in, n_out, gain=1.0):
        w = jax.random.normal(k, (n_in, n_out), jnp.float32) * (gain / jnp.sqrt(n_in))
        b = jnp.zeros((1, n_out), jnp.float32)
        return w, b

    w1, b1 = lin(ks[0], obs_flat, linear_size)          # conv[0]
    w2, b2 = lin(ks[1], linear_size, linear_size)       # conv[2]
    wa, ba = lin(ks[2], action_n, linear_size)          # input_action_linear
    wr, br = lin(ks[3], linear_size, 1)                 # reward_bounty_linear
    wd1, bd1 = lin(ks[4], linear_size, linear_size)     # deconv[0]
    wd2, bd2 = lin(ks[5], linear_size, obs_flat)        # deconv[2]
    return dict(w1=w1, b1=b1, w2=w2, b2=b2, wa=wa, ba=ba, wr=wr, br=br,
                wd1=wd1, bd1=bd1, wd2=wd2, bd2=bd2)


def _reference_forward(x, a, p):
    """Pure-JAX f32 reference for a correctness sanity check."""
    h1 = jnp.tanh(x @ p["w1"] + p["b1"])
    conved = jnp.tanh(h1 @ p["w2"] + p["b2"])
    before = conved * (a @ p["wa"] + p["ba"])
    reward = before @ p["wr"] + p["br"]
    d1 = jnp.tanh(before @ p["wd1"] + p["bd1"])
    pred = d1 @ p["wd2"] + p["bd2"]
    return pred, reward


if __name__ == "__main__":
    key = jax.random.PRNGKey(0)
    B, obs_flat, action_n = 8, 16, 8          # input_observation_shape=(16,), Discrete(8)
    input_observation_shape = (obs_flat,)
    output_observation_shape = (obs_flat,)

    k_x, k_a, k_p = jax.random.split(key, 3)
    x = jax.random.normal(k_x, (B, obs_flat), jnp.float32)
    action_idx = jax.random.randint(k_a, (B,), 0, action_n)
    action_onehot = jax.nn.one_hot(action_idx, action_n, dtype=jnp.float32)

    params = init_params(k_p, obs_flat, action_n, LINEAR_SIZE)

    fwd = jax.jit(transition_model_forward,
                  static_argnames=("output_observation_shape", "tile_b"))
    predicted_state, predicted_reward = fwd(
        x, action_onehot, params, output_observation_shape)
    jax.block_until_ready((predicted_state, predicted_reward))

    # sanity-check vs pure-JAX f32 reference (bf16 MXU inputs -> looser tolerance)
    ref_state_flat, ref_reward = _reference_forward(x, action_onehot, params)
    assert predicted_state.shape == (B,) + output_observation_shape
    assert predicted_reward.shape == (B, 1)
    assert jnp.allclose(predicted_state.reshape(B, -1), ref_state_flat,
                        atol=5e-2, rtol=5e-2)
    assert jnp.allclose(predicted_reward, ref_reward, atol=5e-2, rtol=5e-2)

    print("KERNEL_OK")
</pallas_src>

<mosaic_0001>
module attributes {stable_mosaic.version = 11 : i64} {
  func.func @_transition_kernel(%arg0: i32, %arg1: memref<8x128xbf16, #tpu.memory_space<vmem>>, %arg2: memref<8x128xbf16, #tpu.memory_space<vmem>>, %arg3: memref<128x256xbf16, #tpu.memory_space<vmem>>, %arg4: memref<1x256xf32, #tpu.memory_space<vmem>>, %arg5: memref<256x256xbf16, #tpu.memory_space<vmem>>, %arg6: memref<1x256xf32, #tpu.memory_space<vmem>>, %arg7: memref<128x256xbf16, #tpu.memory_space<vmem>>, %arg8: memref<1x256xf32, #tpu.memory_space<vmem>>, %arg9: memref<1x256xf32, #tpu.memory_space<vmem>>, %arg10: memref<1x1xf32, #tpu.memory_space<vmem>>, %arg11: memref<256x256xbf16, #tpu.memory_space<vmem>>, %arg12: memref<1x256xf32, #tpu.memory_space<vmem>>, %arg13: memref<256x128xbf16, #tpu.memory_space<vmem>>, %arg14: memref<1x128xf32, #tpu.memory_space<vmem>>, %arg15: memref<8x128xf32, #tpu.memory_space<vmem>>, %arg16: memref<8x128xf32, #tpu.memory_space<vmem>>) attributes {dimension_semantics = [#tpu.dimension_semantics<parallel>], iteration_bounds = array<i64: 1>, scalar_prefetch = 0 : i64, scratch_operands = 0 : i64, tpu.core_type = #tpu.core_type<tc>, window_params = [{transform_indices = @transform_0, window_bounds = array<i64: 8, 128>}, {transform_indices = @transform_1, window_bounds = array<i64: 8, 128>}, {pipeline_mode = #tpu.pipeline_mode<synchronous>, transform_indices = @transform_2, window_bounds = array<i64: 128, 256>}, {pipeline_mode = #tpu.pipeline_mode<synchronous>, transform_indices = @transform_3, window_bounds = array<i64: 1, 256>}, {pipeline_mode = #tpu.pipeline_mode<synchronous>, transform_indices = @transform_4, window_bounds = array<i64: 256, 256>}, {pipeline_mode = #tpu.pipeline_mode<synchronous>, transform_indices = @transform_5, window_bounds = array<i64: 1, 256>}, {pipeline_mode = #tpu.pipeline_mode<synchronous>, transform_indices = @transform_6, window_bounds = array<i64: 128, 256>}, {pipeline_mode = #tpu.pipeline_mode<synchronous>, transform_indices = @transform_7, window_bounds = array<i64: 1, 256>}, {pipeline_mode = #tpu.pipeline_mode<synchronous>, transform_indices = @transform_8, window_bounds = array<i64: 1, 256>}, {pipeline_mode = #tpu.pipeline_mode<synchronous>, transform_indices = @transform_9, window_bounds = array<i64: 1, 1>}, {pipeline_mode = #tpu.pipeline_mode<synchronous>, transform_indices = @transform_10, window_bounds = array<i64: 256, 256>}, {pipeline_mode = #tpu.pipeline_mode<synchronous>, transform_indices = @transform_11, window_bounds = array<i64: 1, 256>}, {pipeline_mode = #tpu.pipeline_mode<synchronous>, transform_indices = @transform_12, window_bounds = array<i64: 256, 128>}, {pipeline_mode = #tpu.pipeline_mode<synchronous>, transform_indices = @transform_13, window_bounds = array<i64: 1, 128>}, {transform_indices = @transform_14, window_bounds = array<i64: 8, 128>}, {transform_indices = @transform_15, window_bounds = array<i64: 8, 128>}]} {
    %c0 = arith.constant 0 : index
    %c0_0 = arith.constant 0 : index
    %0 = vector.load %arg1[%c0, %c0_0] : memref<8x128xbf16, #tpu.memory_space<vmem>>, vector<8x128xbf16>
    %c0_1 = arith.constant 0 : index
    %c0_2 = arith.constant 0 : index
    %1 = vector.load %arg3[%c0_1, %c0_2] : memref<128x256xbf16, #tpu.memory_space<vmem>>, vector<128x256xbf16>
    %cst = arith.constant dense<0.000000e+00> : vector<8x256xf32>
    %2 = tpu.matmul %0, %1, %cst {dimension_numbers = #tpu.dot_dimension_numbers<[1], [0], [0], [1], [0, 0, 1, 1], [], []>} : vector<8x128xbf16>, vector<128x256xbf16>, vector<8x256xf32> -> vector<8x256xf32>
    %c0_3 = arith.constant 0 : index
    %c0_4 = arith.constant 0 : index
    %3 = vector.load %arg4[%c0_3, %c0_4] : memref<1x256xf32, #tpu.memory_space<vmem>>, vector<1x256xf32>
    %4 = vector.broadcast %3 : vector<1x256xf32> to vector<8x256xf32>
    %5 = arith.addf %2, %4 : vector<8x256xf32>
    %6 = math.tanh %5 : vector<8x256xf32>
    %7 = arith.truncf %6 : vector<8x256xf32> to vector<8x256xbf16>
    %c0_5 = arith.constant 0 : index
    %c0_6 = arith.constant 0 : index
    %8 = vector.load %arg5[%c0_5, %c0_6] : memref<256x256xbf16, #tpu.memory_space<vmem>>, vector<256x256xbf16>
    %cst_7 = arith.constant dense<0.000000e+00> : vector<8x256xf32>
    %9 = tpu.matmul %7, %8, %cst_7 {dimension_numbers = #tpu.dot_dimension_numbers<[1], [0], [0], [1], [0, 0, 1, 1], [], []>} : vector<8x256xbf16>, vector<256x256xbf16>, vector<8x256xf32> -> vector<8x256xf32>
    %c0_8 = arith.constant 0 : index
    %c0_9 = arith.constant 0 : index
    %10 = vector.load %arg6[%c0_8, %c0_9] : memref<1x256xf32, #tpu.memory_space<vmem>>, vector<1x256xf32>
    %11 = vector.broadcast %10 : vector<1x256xf32> to vector<8x256xf32>
    %12 = arith.addf %9, %11 : vector<8x256xf32>
    %13 = math.tanh %12 : vector<8x256xf32>
    %c0_10 = arith.constant 0 : index
    %c0_11 = arith.constant 0 : index
    %14 = vector.load %arg2[%c0_10, %c0_11] : memref<8x128xbf16, #tpu.memory_space<vmem>>, vector<8x128xbf16>
    %c0_12 = arith.constant 0 : index
    %c0_13 = arith.constant 0 : index
    %15 = vector.load %arg7[%c0_12, %c0_13] : memref<128x256xbf16, #tpu.memory_space<vmem>>, vector<128x256xbf16>
    %cst_14 = arith.constant dense<0.000000e+00> : vector<8x256xf32>
    %16 = tpu.matmul %14, %15, %cst_14 {dimension_numbers = #tpu.dot_dimension_numbers<[1], [0], [0], [1], [0, 0, 1, 1], [], []>} : vector<8x128xbf16>, vector<128x256xbf16>, vector<8x256xf32> -> vector<8x256xf32>
    %c0_15 = arith.constant 0 : index
    %c0_16 = arith.constant 0 : index
    %17 = vector.load %arg8[%c0_15, %c0_16] : memref<1x256xf32, #tpu.memory_space<vmem>>, vector<1x256xf32>
    %18 = vector.broadcast %17 : vector<1x256xf32> to vector<8x256xf32>
    %19 = arith.addf %16, %18 : vector<8x256xf32>
    %20 = arith.mulf %13, %19 : vector<8x256xf32>
    %c0_17 = arith.constant 0 : index
    %c0_18 = arith.constant 0 : index
    %21 = vector.load %arg9[%c0_17, %c0_18] : memref<1x256xf32, #tpu.memory_space<vmem>>, vector<1x256xf32>
    %22 = vector.broadcast %21 : vector<1x256xf32> to vector<8x256xf32>
    %23 = arith.mulf %20, %22 : vector<8x256xf32>
    %cst_19 = arith.constant dense<0.000000e+00> : vector<8xf32>
    %24 = vector.multi_reduction <add>, %23, %cst_19 [1] : vector<8x256xf32> to vector<8xf32>
    %25 = vector.shape_cast %24 : vector<8xf32> to vector<8x1xf32>
    %c0_20 = arith.constant 0 : index
    %c0_21 = arith.constant 0 : index
    %26 = vector.load %arg10[%c0_20, %c0_21] : memref<1x1xf32, #tpu.memory_space<vmem>>, vector<1x1xf32>
    %27 = vector.broadcast %26 : vector<1x1xf32> to vector<8x1xf32>
    %28 = arith.addf %25, %27 : vector<8x1xf32>
    %29 = vector.shape_cast %28 : vector<8x1xf32> to vector<8x1xf32>
    %30 = vector.broadcast %29 : vector<8x1xf32> to vector<8x128xf32>
    %c0_22 = arith.constant 0 : index
    %c0_23 = arith.constant 0 : index
    %31 = vector.load %arg16[%c0_22, %c0_23] : memref<8x128xf32, #tpu.memory_space<vmem>>, vector<8x128xf32>
    tpu.vector_store %arg16[%c0_22, %c0_23], %30 {strides = array<i32>} : memref<8x128xf32, #tpu.memory_space<vmem>>, vector<8x128xf32>,
    %32 = arith.truncf %20 : vector<8x256xf32> to vector<8x256xbf16>
    %c0_24 = arith.constant 0 : index
    %c0_25 = arith.constant 0 : index
    %33 = vector.load %arg11[%c0_24, %c0_25] : memref<256x256xbf16, #tpu.memory_space<vmem>>, vector<256x256xbf16>
    %cst_26 = arith.constant dense<0.000000e+00> : vector<8x256xf32>
    %34 = tpu.matmul %32, %33, %cst_26 {dimension_numbers = #tpu.dot_dimension_numbers<[1], [0], [0], [1], [0, 0, 1, 1], [], []>} : vector<8x256xbf16>, vector<256x256xbf16>, vector<8x256xf32> -> vector<8x256xf32>
    %c0_27 = arith.constant 0 : index
    %c0_28 = arith.constant 0 : index
    %35 = vector.load %arg12[%c0_27, %c0_28] : memref<1x256xf32, #tpu.memory_space<vmem>>, vector<1x256xf32>
    %36 = vector.broadcast %35 : vector<1x256xf32> to vector<8x256xf32>
    %37 = arith.addf %34, %36 : vector<8x256xf32>
    %38 = math.tanh %37 : vector<8x256xf32>
    %39 = arith.truncf %38 : vector<8x256xf32> to vector<8x256xbf16>
    %c0_29 = arith.constant 0 : index
    %c0_30 = arith.constant 0 : index
    %40 = vector.load %arg13[%c0_29, %c0_30] : memref<256x128xbf16, #tpu.memory_space<vmem>>, vector<256x128xbf16>
    %cst_31 = arith.constant dense<0.000000e+00> : vector<8x128xf32>
    %41 = tpu.matmul %39, %40, %cst_31 {dimension_numbers = #tpu.dot_dimension_numbers<[1], [0], [0], [1], [0, 0, 1, 1], [], []>} : vector<8x256xbf16>, vector<256x128xbf16>, vector<8x128xf32> -> vector<8x128xf32>
    %c0_32 = arith.constant 0 : index
    %c0_33 = arith.constant 0 : index
    %42 = vector.load %arg14[%c0_32, %c0_33] : memref<1x128xf32, #tpu.memory_space<vmem>>, vector<1x128xf32>
    %43 = vector.broadcast %42 : vector<1x128xf32> to vector<8x128xf32>
    %44 = arith.addf %41, %43 : vector<8x128xf32>
    %c0_34 = arith.constant 0 : index
    %c0_35 = arith.constant 0 : index
    %45 = vector.load %arg15[%c0_34, %c0_35] : memref<8x128xf32, #tpu.memory_space<vmem>>, vector<8x128xf32>
    tpu.vector_store %arg15[%c0_34, %c0_35], %44 {strides = array<i32>} : memref<8x128xf32, #tpu.memory_space<vmem>>, vector<8x128xf32>,
    return
  }
  func.func @transform_0(%arg0: i32) -> (i32, i32) {
    %c0_i32 = arith.constant 0 : i32
    %c0_i32_0 = arith.constant 0 : i32
    return %arg0, %c0_i32 : i32, i32
  }
  func.func @transform_1(%arg0: i32) -> (i32, i32) {
    %c0_i32 = arith.constant 0 : i32
    %c0_i32_0 = arith.constant 0 : i32
    return %arg0, %c0_i32 : i32, i32
  }
  func.func @transform_2(%arg0: i32) -> (i32, i32) {
    %c0_i32 = arith.constant 0 : i32
    %c0_i32_0 = arith.constant 0 : i32
    %c0_i32_1 = arith.constant 0 : i32
    return %c0_i32, %c0_i32_0 : i32, i32
  }
  func.func @transform_3(%arg0: i32) -> (i32, i32) {
    %c0_i32 = arith.constant 0 : i32
    %c0_i32_0 = arith.constant 0 : i32
    %c0_i32_1 = arith.constant 0 : i32
    return %c0_i32, %c0_i32_0 : i32, i32
  }
  func.func @transform_4(%arg0: i32) -> (i32, i32) {
    %c0_i32 = arith.constant 0 : i32
    %c0_i32_0 = arith.constant 0 : i32
    %c0_i32_1 = arith.constant 0 : i32
    return %c0_i32, %c0_i32_0 : i32, i32
  }
  func.func @transform_5(%arg0: i32) -> (i32, i32) {
    %c0_i32 = arith.constant 0 : i32
    %c0_i32_0 = arith.constant 0 : i32
    %c0_i32_1 = arith.constant 0 : i32
    return %c0_i32, %c0_i32_0 : i32, i32
  }
  func.func @transform_6(%arg0: i32) -> (i32, i32) {
    %c0_i32 = arith.constant 0 : i32
    %c0_i32_0 = arith.constant 0 : i32
    %c0_i32_1 = arith.constant 0 : i32
    return %c0_i32, %c0_i32_0 : i32, i32
  }
  func.func @transform_7(%arg0: i32) -> (i32, i32) {
    %c0_i32 = arith.constant 0 : i32
    %c0_i32_0 = arith.constant 0 : i32
    %c0_i32_1 = arith.constant 0 : i32
    return %c0_i32, %c0_i32_0 : i32, i32
  }
  func.func @transform_8(%arg0: i32) -> (i32, i32) {
    %c0_i32 = arith.constant 0 : i32
    %c0_i32_0 = arith.constant 0 : i32
    %c0_i32_1 = arith.constant 0 : i32
    return %c0_i32, %c0_i32_0 : i32, i32
  }
  func.func @transform_9(%arg0: i32) -> (i32, i32) {
    %c0_i32 = arith.constant 0 : i32
    %c0_i32_0 = arith.constant 0 : i32
    %c0_i32_1 = arith.constant 0 : i32
    return %c0_i32, %c0_i32_0 : i32, i32
  }
  func.func @transform_10(%arg0: i32) -> (i32, i32) {
    %c0_i32 = arith.constant 0 : i32
    %c0_i32_0 = arith.constant 0 : i32
    %c0_i32_1 = arith.constant 0 : i32
    return %c0_i32, %c0_i32_0 : i32, i32
  }
  func.func @transform_11(%arg0: i32) -> (i32, i32) {
    %c0_i32 = arith.constant 0 : i32
    %c0_i32_0 = arith.constant 0 : i32
    %c0_i32_1 = arith.constant 0 : i32
    return %c0_i32, %c0_i32_0 : i32, i32
  }
  func.func @transform_12(%arg0: i32) -> (i32, i32) {
    %c0_i32 = arith.constant 0 : i32
    %c0_i32_0 = arith.constant 0 : i32
    %c0_i32_1 = arith.constant 0 : i32
    return %c0_i32, %c0_i32_0 : i32, i32
  }
  func.func @transform_13(%arg0: i32) -> (i32, i32) {
    %c0_i32 = arith.constant 0 : i32
    %c0_i32_0 = arith.constant 0 : i32
    %c0_i32_1 = arith.constant 0 : i32
    return %c0_i32, %c0_i32_0 : i32, i32
  }
  func.func @transform_14(%arg0: i32) -> (i32, i32) {
    %c0_i32 = arith.constant 0 : i32
    %c0_i32_0 = arith.constant 0 : i32
    return %arg0, %c0_i32 : i32, i32
  }
  func.func @transform_15(%arg0: i32) -> (i32, i32) {
    %c0_i32 = arith.constant 0 : i32
    %c0_i32_0 = arith.constant 0 : i32
    return %arg0, %c0_i32 : i32, i32
  }
}

</mosaic_0001>

<bundles_post_ra>
// kernel: transition_model_forward.1
= control target key start
LH: loop header
LB: loop body
LE: loop exit
PB: predicated region body
PF: predicated region fallthrough
CT: control target
= control target key end

     0   :  { %s1883_s0 = inlined_call_operand.vmem [shape: bf16[8,128], index: 0, kind: input, shape index: {}]   ;;  %s1884_s1 = inlined_call_operand.vmem [shape: bf16[8,128], index: 1, kind: input, shape index: {}]   ;;  %s1885_s2 = inlined_call_operand.vmem [shape: bf16[128,256], index: 2, kind: input, shape index: {}]   ;;  %s1886_s3 = inlined_call_operand.vmem [shape: f32[1,256], index: 3, kind: input, shape index: {}]   ;;  %s1887_s4 = inlined_call_operand.vmem [shape: bf16[256,256], index: 4, kind: input, shape index: {}]   ;;  %s1888_s5 = inlined_call_operand.vmem [shape: f32[1,256], index: 5, kind: input, shape index: {}]   ;;  %s1889_s6 = inlined_call_operand.vmem [shape: bf16[128,256], index: 6, kind: input, shape index: {}]   ;;  %s1890_s7 = inlined_call_operand.vmem [shape: f32[1,256], index: 7, kind: input, shape index: {}]   ;;  %s1891_s8 = inlined_call_operand.vmem [shape: f32[1,256], index: 8, kind: input, shape index: {}]   ;;  %s1892_s9 = inlined_call_operand.<no memory space> [shape: f32[1,1], index: 9, kind: input, shape index: {}]   ;;  %s1893_s10 = inlined_call_operand.vmem [shape: bf16[256,256], index: 10, kind: input, shape index: {}]   ;;  %s1894_s11 = inlined_call_operand.vmem [shape: f32[1,256], index: 11, kind: input, shape index: {}]   ;;  %s1895_s12 = inlined_call_operand.vmem [shape: bf16[256,128], index: 12, kind: input, shape index: {}]   ;;  %s1896_s13 = inlined_call_operand.vmem [shape: f32[1,128], index: 13, kind: input, shape index: {}]   ;;  %s1897_s14 = inlined_call_operand.hbm [shape: f32[8,128], index: 14, kind: output, shape index: {0}]   ;;  %s1898_s15 = inlined_call_operand.vmem [shape: f32[8,128], index: 15, kind: output, shape index: {1}]  }
   0x1   :  { %v21_v0 = vstv %s1892_s9 }
   0x2   :  { %22 = vst [vmem:[#allocation2] sm:$0x1] %v21_v0 }
   0x3   :  { %v1221_v1 = vld [vmem:[%s1885_s2 + $0x74] ss:$8 sps:$4 sm:$0xff]   ;;  %v1223_v2 = vld [vmem:[%s1885_s2 + $0x70] ss:$8 sps:$4 sm:$0xff]   ;;  %v1415_v3 = vmov 0  }
   0x4   :  { %194 = vmatprep.mubr.bf16.mxu0 %v1415_v3  ;;  %1220 = vset.pattern.permute.xlu0 %v1415_v3  ;;  %v1224_v4 = vld [vmem:[%s1885_s2 + $0x64] ss:$8 sps:$4 sm:$0xff]   ;;  %v1226_v5 = vld [vmem:[%s1885_s2 + $0x60] ss:$8 sps:$4 sm:$0xff]   ;;  %v1227_v6 = vld [vmem:[%s1885_s2 + $0x54] ss:$8 sps:$4 sm:$0xff]  }
   0x5   :  { %162 = vmatprep.subr.bf16.mxu0 %v1221_v1  ;;  %v1229_v7 = vld [vmem:[%s1885_s2 + $0x50] ss:$8 sps:$4 sm:$0xff]   ;;  %v1230_v8 = vld [vmem:[%s1885_s2 + $0x44] ss:$8 sps:$4 sm:$0xff]   ;;  %v1232_v9 = vld [vmem:[%s1885_s2 + $0x40] ss:$8 sps:$4 sm:$0xff]  }
   0x6   :  { %163 = vmatpush1.bf16.msra.mxu0 %v1223_v2  ;;  %v1233_v10 = vld [vmem:[%s1885_s2 + $0x34] ss:$8 sps:$4 sm:$0xff]   ;;  %v1247_v12 = vld [vmem:[%s1887_s4 + $0x70] ss:$8 sps:$4 sm:$0xff]   ;;  %v1248_v13 = vld [vmem:[%s1887_s4 + $0x64] ss:$8 sps:$4 sm:$0xff]  }
   0x7   :  { %164 = vmatprep.subr.bf16.mxu0 %v1224_v4  ;;  %v1245_v11 = vld [vmem:[%s1887_s4 + $0x74] ss:$8 sps:$4 sm:$0xff]   ;;  %v1235_v14 = vld [vmem:[%s1885_s2 + $0x30] ss:$8 sps:$4 sm:$0xff]   ;;  %v1250_v15 = vld [vmem:[%s1887_s4 + $0x60] ss:$8 sps:$4 sm:$0xff]  }
   0x8   :  { %411 = vmatprep.subr.bf16.mxu1 %v1245_v11  ;;  %v1251_v16 = vld [vmem:[%s1887_s4 + $0x54] ss:$8 sps:$4 sm:$0xff]   ;;  %v1236_v17 = vld [vmem:[%s1885_s2 + $0x24] ss:$8 sps:$4 sm:$0xff]   ;;  %v1238_v18 = vld [vmem:[%s1885_s2 + $0x20] ss:$8 sps:$4 sm:$0xff]  }
   0x9   :  { %412 = vmatpush1.bf16.msra.mxu1 %v1247_v12  ;;  %v1253_v19 = vld [vmem:[%s1887_s4 + $0x50] ss:$8 sps:$4 sm:$0xff]   ;;  %v1254_v20 = vld [vmem:[%s1887_s4 + $0x44] ss:$8 sps:$4 sm:$0xff]   ;;  %v1239_v21 = vld [vmem:[%s1885_s2 + $0x14] ss:$8 sps:$4 sm:$0xff]  }
   0xa   :  { %165 = vmatpush1.bf16.msra.mxu0 %v1226_v5  ;;  %413 = vmatprep.subr.bf16.mxu1 %v1248_v13  ;;  %v1241_v22 = vld [vmem:[%s1885_s2 + $0x10] ss:$8 sps:$4 sm:$0xff]   ;;  %v1256_v23 = vld [vmem:[%s1887_s4 + $0x40] ss:$8 sps:$4 sm:$0xff]   ;;  %v1257_v24 = vld [vmem:[%s1887_s4 + $0x34] ss:$8 sps:$4 sm:$0xff]  }
   0xb   :  { %166 = vmatprep.subr.bf16.mxu0 %v1227_v6  ;;  %v1242_v25 = vld [vmem:[%s1885_s2 + $0x4] ss:$8 sps:$4 sm:$0xff]   ;;  %v1244_v26 = vld [vmem:[%s1885_s2] ss:$8 sps:$4 sm:$0xff]   ;;  %v1259_v27 = vld [vmem:[%s1887_s4 + $0x30] ss:$8 sps:$4 sm:$0xff]  }
   0xc   :  { %v1260_v28 = vld [vmem:[%s1887_s4 + $0x24] ss:$8 sps:$4 sm:$0xff]   ;;  %v1279_v29 = vld [vmem:[%s1889_s6 + $0x74] ss:$8 sps:$4 sm:$0xff]   ;;  %v1262_v30 = vld [vmem:[%s1887_s4 + $0x20] ss:$8 sps:$4 sm:$0xff]  }
   0xd   :  { %414 = vmatpush1.bf16.msra.mxu1 %v1250_v15  ;;  %v53_v31 = vld [vmem:[%s1883_s0] sm:$0xf]  ;;  %v1263_v32 = vld [vmem:[%s1887_s4 + $0x14] ss:$8 sps:$4 sm:$0xff]   ;;  %v1277_v33 = vld [vmem:[%s1889_s6 + $0x70] ss:$8 sps:$4 sm:$0xff]  }
   0xe   :  { %167 = vmatpush1.bf16.msra.mxu0 %v1229_v7  ;;  %415 = vmatprep.subr.bf16.mxu1 %v1251_v16  ;;  %v1265_v34 = vld [vmem:[%s1887_s4 + $0x10] ss:$8 sps:$4 sm:$0xff]   ;;  %v1266_v35 = vld [vmem:[%s1887_s4 + $0x4] ss:$8 sps:$4 sm:$0xff]   ;;  %v1268_v36 = vld [vmem:[%s1887_s4] ss:$8 sps:$4 sm:$0xff]  }
   0xf   :  { %168 = vmatprep.subr.bf16.mxu0 %v1230_v8  ;;  %v1269_v37 = vld [vmem:[%s1887_s4 + $0xf4] ss:$8 sps:$4 sm:$0xff]   ;;  %v1271_v38 = vld [vmem:[%s1887_s4 + $0xf0] ss:$8 sps:$4 sm:$0xff]   ;;  %v1272_v39 = vld [vmem:[%s1887_s4 + $0xe4] ss:$8 sps:$4 sm:$0xff]  }
  0x10   :  { %v1274_v40 = vld [vmem:[%s1887_s4 + $0xe0] ss:$8 sps:$4 sm:$0xff]   ;;  %v1275_v41 = vld [vmem:[%s1887_s4 + $0xd4] ss:$8 sps:$4 sm:$0xff]   ;;  %v1280_v42 = vld [vmem:[%s1887_s4 + $0xd0] ss:$8 sps:$4 sm:$0xff]  }
  0x11   :  { %416 = vmatpush1.bf16.msra.mxu1 %v1253_v19 }
  0x12   :  { %169 = vmatpush1.bf16.msra.mxu0 %v1232_v9  ;;  %417 = vmatprep.subr.bf16.mxu1 %v1254_v20 }
  0x13   :  { %170 = vmatprep.subr.bf16.mxu0 %v1233_v10 }
  0x15   :  { %418 = vmatpush1.bf16.msra.mxu1 %v1256_v23 }
  0x16   :  { %171 = vmatpush1.bf16.msra.mxu0 %v1235_v14  ;;  %419 = vmatprep.subr.bf16.mxu1 %v1257_v24 }
  0x17   :  { %172 = vmatprep.subr.bf16.mxu0 %v1236_v17 }
  0x19   :  { %420 = vmatpush1.bf16.msra.mxu1 %v1259_v27 }
  0x1a   :  { %173 = vmatpush1.bf16.msra.mxu0 %v1238_v18  ;;  %421 = vmatprep.subr.bf16.mxu1 %v1260_v28 }
  0x1b   :  { %174 = vmatprep.subr.bf16.mxu0 %v1239_v21 }
  0x1d   :  { %422 = vmatpush1.bf16.msra.mxu1 %v1262_v30 }
  0x1e   :  { %175 = vmatpush1.bf16.msra.mxu0 %v1241_v22  ;;  %423 = vmatprep.subr.bf16.mxu1 %v1263_v32 }
  0x1f   :  { %176 = vmatprep.subr.bf16.mxu0 %v1242_v25 }
  0x21   :  { %424 = vmatpush1.bf16.msra.mxu1 %v1265_v34 }
  0x22   :  { %177 = vmatpush1.bf16.msra.mxu0 %v1244_v26  ;;  %425 = vmatprep.subr.bf16.mxu1 %v1266_v35 }
  0x23   :  { %563 = vmatprep.subr.bf16.mxu0 %v1279_v29 }
  0x25   :  { %195 = vmatmul.mubr.bf16.vlgmr.msra.gmra.mxu0 %v53_v31  ;;  %426 = vmatpush1.bf16.msra.mxu1 %v1268_v36 }
  0x26   :  { %564 = vmatpush1.bf16.msra.mxu0 %v1277_v33  ;;  %595 = vmatprep.mubr.bf16.mxu0 %v1415_v3 }
  0x27   :  { %427 = vmatprep.subr.bf16.mxu1 %v1269_v37 }
  0x29   :  { %428 = vmatpush2.bf16.msra.mxu1 %v1271_v38 }
  0x2a   :  { %429 = vmatprep.subr.bf16.mxu1 %v1272_v39 }
  0x2d   :  { %430 = vmatpush2.bf16.msra.mxu1 %v1274_v40 }
  0x2e   :  { %431 = vmatprep.subr.bf16.mxu1 %v1275_v41 }
  0x31   :  { %432 = vmatpush2.bf16.msra.mxu1 %v1280_v42 }
  0x32   :  { %23 = vsyncpa [#allocation4], 0  ;;  %v1281_v43 = vld [vmem:[%s1887_s4 + $0xc4] ss:$8 sps:$4 sm:$0xff]   ;;  %v1283_v45 = vld [vmem:[%s1889_s6 + $0x60] ss:$8 sps:$4 sm:$0xff]   ;;  %v72_v24 = vlaneseq }
  0x33   :  { %v1285_v44 = vld [vmem:[%s1889_s6 + $0x64] ss:$8 sps:$4 sm:$0xff]   ;;  %v1286_v46 = vld [vmem:[%s1887_s4 + $0xc0] ss:$8 sps:$4 sm:$0xff]   ;;  %433 = vmatprep.subr.bf16.mxu1 %v1281_v43  ;;  %v1287_v47 = vld [vmem:[%s1887_s4 + $0xb4] ss:$8 sps:$4 sm:$0xff]  }
  0x34   :  { %565 = vmatprep.subr.bf16.mxu0 %v1285_v44  ;;  %v1291_v48 = vld [vmem:[%s1889_s6 + $0x54] ss:$8 sps:$4 sm:$0xff]   ;;  %v1289_v49 = vld [vmem:[%s1889_s6 + $0x50] ss:$8 sps:$4 sm:$0xff]   ;;  %v1293_v51 = vld [vmem:[%s1887_s4 + $0xa4] ss:$8 sps:$4 sm:$0xff]  }
  0x35   :  { %434 = vmatpush2.bf16.msra.mxu1 %v1286_v46  ;;  %566 = vmatpush1.bf16.msra.mxu0 %v1283_v45  ;;  %v1292_v50 = vld [vmem:[%s1887_s4 + $0xb0] ss:$8 sps:$4 sm:$0xff]   ;;  %v1297_v52 = vld [vmem:[%s1889_s6 + $0x44] ss:$8 sps:$4 sm:$0xff]   ;;  %v1295_v53 = vld [vmem:[%s1889_s6 + $0x40] ss:$8 sps:$4 sm:$0xff]  }
  0x36   :  { %435 = vmatprep.subr.bf16.mxu1 %v1287_v47  ;;  %567 = vmatprep.subr.bf16.mxu0 %v1291_v48  ;;  %v1298_v54 = vld [vmem:[%s1887_s4 + $0xa0] ss:$8 sps:$4 sm:$0xff]   ;;  %v1299_v55 = vld [vmem:[%s1887_s4 + $0x94] ss:$8 sps:$4 sm:$0xff]   ;;  %v1301_v57 = vld [vmem:[%s1889_s6 + $0x30] ss:$8 sps:$4 sm:$0xff]  }
  0x37   :  { %v1303_v56 = vld [vmem:[%s1889_s6 + $0x34] ss:$8 sps:$4 sm:$0xff]   ;;  %v1304_v58 = vld [vmem:[%s1887_s4 + $0x90] ss:$8 sps:$4 sm:$0xff]   ;;  %v1305_v59 = vld [vmem:[%s1887_s4 + $0x84] ss:$8 sps:$4 sm:$0xff]  }
  0x38   :  { %v1309_v60 = vld [vmem:[%s1889_s6 + $0x24] ss:$8 sps:$4 sm:$0xff]   ;;  %v1307_v61 = vld [vmem:[%s1889_s6 + $0x20] ss:$8 sps:$4 sm:$0xff]   ;;  %v1313_v63 = vld [vmem:[%s1889_s6 + $0x14] ss:$8 sps:$4 sm:$0xff]  }
  0x39   :  { %436 = vmatpush2.bf16.msra.mxu1 %v1292_v50  ;;  %568 = vmatpush1.bf16.msra.mxu0 %v1289_v49  ;;  %v1310_v62 = vld [vmem:[%s1887_s4 + $0x80] ss:$8 sps:$4 sm:$0xff]   ;;  %v1311_v0 = vld [vmem:[%s1889_s6 + $0x10] ss:$8 sps:$4 sm:$0xff]   ;;  %v1316_v1 = vld [vmem:[%s1889_s6 + $0x4] ss:$8 sps:$4 sm:$0xff]  }
  0x3a   :  { %437 = vmatprep.subr.bf16.mxu1 %v1293_v51  ;;  %569 = vmatprep.subr.bf16.mxu0 %v1297_v52  ;;  %v1314_v2 = vld [vmem:[%s1889_s6] ss:$8 sps:$4 sm:$0xff]   ;;  %v1319_v3 = vld [vmem:[%s1893_s10 + $0x74] ss:$8 sps:$4 sm:$0xff]   ;;  %v1317_v5 = vld [vmem:[%s1893_s10 + $0x70] ss:$8 sps:$4 sm:$0xff]  }
  0x3b   :  { %v454_v4 = vld [vmem:[%s1884_s1] sm:$0xf]  ;;  %v1322_v6 = vld [vmem:[%s1893_s10 + $0x64] ss:$8 sps:$4 sm:$0xff]   ;;  %v1325_v8 = vld [vmem:[%s1893_s10 + $0x54] ss:$8 sps:$4 sm:$0xff]  }
  0x3c   :  { %v1320_v7 = vld [vmem:[%s1893_s10 + $0x60] ss:$8 sps:$4 sm:$0xff]   ;;  %v1323_v9 = vld [vmem:[%s1893_s10 + $0x50] ss:$8 sps:$4 sm:$0xff]   ;;  %v1328_v10 = vld [vmem:[%s1893_s10 + $0x44] ss:$8 sps:$4 sm:$0xff]  }
  0x3d   :  { %438 = vmatpush2.bf16.msra.mxu1 %v1298_v54  ;;  %570 = vmatpush1.bf16.msra.mxu0 %v1295_v53  ;;  %v1326_v11 = vld [vmem:[%s1893_s10 + $0x40] ss:$8 sps:$4 sm:$0xff]   ;;  %v1331_v12 = vld [vmem:[%s1893_s10 + $0x34] ss:$8 sps:$4 sm:$0xff]   ;;  %v1329_v13 = vld [vmem:[%s1893_s10 + $0x30] ss:$8 sps:$4 sm:$0xff]  }
  0x3e   :  { %439 = vmatprep.subr.bf16.mxu1 %v1299_v55  ;;  %571 = vmatprep.subr.bf16.mxu0 %v1303_v56  ;;  %v1334_v14 = vld [vmem:[%s1893_s10 + $0x24] ss:$8 sps:$4 sm:$0xff]   ;;  %v1332_v15 = vld [vmem:[%s1893_s10 + $0x20] ss:$8 sps:$4 sm:$0xff]   ;;  %v1337_v16 = vld [vmem:[%s1893_s10 + $0x14] ss:$8 sps:$4 sm:$0xff]  }
  0x3f   :  { %v1335_v17 = vld [vmem:[%s1893_s10 + $0x10] ss:$8 sps:$4 sm:$0xff]   ;;  %v1340_v18 = vld [vmem:[%s1893_s10 + $0x4] ss:$8 sps:$4 sm:$0xff]   ;;  %v1338_v19 = vld [vmem:[%s1893_s10] ss:$8 sps:$4 sm:$0xff]  }
  0x40   :  { %v1343_v20 = vld [vmem:[%s1893_s10 + $0xf4] ss:$8 sps:$4 sm:$0xff]   ;;  %v1341_v21 = vld [vmem:[%s1893_s10 + $0xf0] ss:$8 sps:$4 sm:$0xff]   ;;  %v1346_v22 = vld [vmem:[%s1893_s10 + $0xe4] ss:$8 sps:$4 sm:$0xff]  }
  0x41   :  { %440 = vmatpush2.bf16.msra.mxu1 %v1304_v58  ;;  %572 = vmatpush1.bf16.msra.mxu0 %v1301_v57  ;;  %v1344_v23 = vld [vmem:[%s1893_s10 + $0xe0] ss:$8 sps:$4 sm:$0xff]   ;;  %v73_v25 = vshrl.u32 %v72_v24, 7  ;;  %v1349_v41 = vld [vmem:[%s1893_s10 + $0xd4] ss:$8 sps:$4 sm:$0xff]   ;;  %s1416_s24 = smov [#allocation3]  }
  0x42   :  { %441 = vmatprep.subr.bf16.mxu1 %v1305_v59  ;;  %573 = vmatprep.subr.bf16.mxu0 %v1309_v60  ;;  %v70_v27 = vld [vmem:[%s1886_s3] sm:$0x3]  ;;  %v1347_v42 = vld [vmem:[%s1893_s10 + $0xd0] ss:$8 sps:$4 sm:$0xff]   ;;  %v1352_v43 = vld [vmem:[%s1893_s10 + $0xc4] ss:$8 sps:$4 sm:$0xff]  }
  0x43   :  { %v1761_v26 = vsub.s32 0, %v73_v25  ;;  %v1766_v28 = vsub.s32 1, %v73_v25  ;;  %v1350_v44 = vld [vmem:[%s1893_s10 + $0xc0] ss:$8 sps:$4 sm:$0xff]   ;;  %v1355_v45 = vld [vmem:[%s1893_s10 + $0xb4] ss:$8 sps:$4 sm:$0xff]  }
  0x44   :  { %v1353_v46 = vld [vmem:[%s1893_s10 + $0xb0] ss:$8 sps:$4 sm:$0xff]   ;;  %v1358_v49 = vld [vmem:[%s1893_s10 + $0xa4] ss:$8 sps:$4 sm:$0xff]   ;;  %v1356_v50 = vld [vmem:[%s1893_s10 + $0xa0] ss:$8 sps:$4 sm:$0xff]  }
  0x45   :  { %442 = vmatpush2.bf16.msra.mxu1 %v1310_v62  ;;  %574 = vmatpush1.bf16.msra.mxu0 %v1307_v61  ;;  %v75_v29 = vrot.slane %v70_v27, %v1761_v26  ;;  %v79_v30 = vrot.slane %v70_v27, %v1766_v28  ;;  %v1361_v53 = vld [vmem:[%s1893_s10 + $0x94] ss:$8 sps:$4 sm:$0xff]   ;;  %v1359_v54 = vld [vmem:[%s1893_s10 + $0x90] ss:$8 sps:$4 sm:$0xff]   ;;  %v1364_v55 = vld [vmem:[%s1893_s10 + $0x84] ss:$8 sps:$4 sm:$0xff]  }
  0x46   :  { %575 = vmatprep.subr.bf16.mxu0 %v1313_v63  ;;  %v1362_v56 = vld [vmem:[%s1893_s10 + $0x80] ss:$8 sps:$4 sm:$0xff]   ;;  %s1070_s25 = sshll.u32 %s1416_s24, 4  ;;  %s1071_s25 = int_to_ptr.vmem [resolvable:$true] %s1070_s25 }
  0x47   :  { %v239_v57 = vld [vmem:[%s1888_s5] sm:$0x3]  ;;  %v1370_v24 = vld [vmem:[%s1895_s12 + $0x28] sm:$0xff]   ;;  %s1393_s9 = scalar_lea.vmem %s1071_s25, 128  ;;  %p1398_p1 = scmp.lt.s32.totalorder %s1071_s25, %s1071_s25 }
  0x48   :  { %v244_v58 = vrot.slane %v239_v57, %v1761_v26  ;;  %v248_v59 = vrot.slane %v239_v57, %v1766_v28  ;;  %v1371_v25 = vld [vmem:[%s1895_s12 + $0x60] sm:$0xff]   ;;  %p1394_p0 = scmp.ne.s32.totalorder %s1071_s25, %s1393_s9  ;;  %p1399_p2 = scmp.lt.s32.totalorder %s1393_s9, %s1393_s9 }
  0x49   :  { %576 = vmatpush1.bf16.msra.mxu0 %v1311_v0  ;;  %v1372_v27 = vld [vmem:[%s1895_s12 + $0x20] sm:$0xff]  }
  0x4a   :  { %577 = vmatprep.subr.bf16.mxu0 %v1316_v1  ;;  %p1400_p3 = por %p1399_p2, %p1398_p1 }
  0x4c   :  { %p1401_p4 = pnand %p1400_p3, %p1394_p0 }
  0x4d   :  { %578 = vmatpush1.bf16.msra.mxu0 %v1314_v2  ;;  %v471_v2 = vld [vmem:[%s1890_s7] sm:$0x3] }
  0x4e   :  { %843 = vmatprep.subr.bf16.mxu0 %v1319_v3  ;;  %v476_v3 = vrot.slane %v471_v2, %v1761_v26 }
  0x50   :  { %596 = vmatmul.mubr.bf16.vlgmr.msra.gmra.mxu0 %v454_v4 }
  0x51   :  { %844 = vmatpush1.bf16.msra.mxu0 %v1317_v5  ;;  %v480_v5 = vrot.slane %v471_v2, %v1766_v28 }
  0x52   :  { %845 = vmatprep.subr.bf16.mxu0 %v1322_v6  ;;  %v606_v6 = vld [vmem:[%s1891_s8] sm:$0x3] }
  0x55   :  { %846 = vmatpush1.bf16.msra.mxu0 %v1320_v7 }
  0x56   :  { %847 = vmatprep.subr.bf16.mxu0 %v1325_v8 }
  0x59   :  { %848 = vmatpush1.bf16.msra.mxu0 %v1323_v9 }
  0x5a   :  { %849 = vmatprep.subr.bf16.mxu0 %v1328_v10  ;;  %v611_v10 = vrot.slane %v606_v6, %v1761_v26 }
  0x5d   :  { %850 = vmatpush1.bf16.msra.mxu0 %v1326_v11  ;;  %v615_v11 = vrot.slane %v606_v6, %v1766_v28 }
  0x5e   :  { %851 = vmatprep.subr.bf16.mxu0 %v1331_v12 }
  0x61   :  { %852 = vmatpush1.bf16.msra.mxu0 %v1329_v13 }
  0x62   :  { %853 = vmatprep.subr.bf16.mxu0 %v1334_v14 }
  0x65   :  { %854 = vmatpush1.bf16.msra.mxu0 %v1332_v15 }
  0x66   :  { %855 = vmatprep.subr.bf16.mxu0 %v1337_v16 }
  0x69   :  { %856 = vmatpush1.bf16.msra.mxu0 %v1335_v17 }
  0x6a   :  { %857 = vmatprep.subr.bf16.mxu0 %v1340_v18 }
  0x6d   :  { %858 = vmatpush1.bf16.msra.mxu0 %v1338_v19  ;;  %v1365_v19 = vld [vmem:[%s1895_s12 + $0x78] sm:$0xff]  }
  0x6e   :  { %859 = vmatprep.subr.bf16.mxu0 %v1343_v20  ;;  %v1366_v20 = vld [vmem:[%s1895_s12 + $0x38] sm:$0xff]   ;;  %1196 = vmatprep.subr.bf16.mxu1 %v1365_v19 }
  0x71   :  { %860 = vmatpush2.bf16.msra.mxu0 %v1341_v21  ;;  %v1367_v21 = vld [vmem:[%s1895_s12 + $0x70] sm:$0xff]  }
  0x72   :  { %861 = vmatprep.subr.bf16.mxu0 %v1346_v22  ;;  %v1368_v22 = vld [vmem:[%s1895_s12 + $0x30] sm:$0xff]  }
  0x75   :  { %862 = vmatpush2.bf16.msra.mxu0 %v1344_v23  ;;  %v1369_v23 = vld [vmem:[%s1895_s12 + $0x68] sm:$0xff]  }
  0x76   :  { %863 = vmatprep.subr.bf16.mxu0 %v1349_v41 }
  0x79   :  { %864 = vmatpush2.bf16.msra.mxu0 %v1347_v42 }
  0x7a   :  { %865 = vmatprep.subr.bf16.mxu0 %v1352_v43 }
  0x7d   :  { %866 = vmatpush2.bf16.msra.mxu0 %v1350_v44 }
  0x7e   :  { %867 = vmatprep.subr.bf16.mxu0 %v1355_v45 }
  0x81   :  { %868 = vmatpush2.bf16.msra.mxu0 %v1353_v46 }
  0x82   :  { %869 = vmatprep.subr.bf16.mxu0 %v1358_v49 }
  0x85   :  { %870 = vmatpush2.bf16.msra.mxu0 %v1356_v50 }
  0x86   :  { %871 = vmatprep.subr.bf16.mxu0 %v1361_v53 }
  0x89   :  { %872 = vmatpush2.bf16.msra.mxu0 %v1359_v54  ;;  %v1179_v54 = vld [vmem:[%s1896_s13] ss:$0 sm:$0xff] }
  0x8a   :  { %873 = vmatprep.subr.bf16.mxu0 %v1364_v55 }
  0x8d   :  { %874 = vmatpush2.bf16.msra.mxu0 %v1362_v56 }
  0xe5   :  { %v196_v31 = vpop.f32.mrf.mxu0 }
  0xe6   :  { %v197_v32 = vadd.f32 %v196_v31, %v75_v29  ;;  %v1373_v29 = vld [vmem:[%s1895_s12 + $0x58] sm:$0xff]   ;;  %v1375_v31 = vld [vmem:[%s1895_s12 + $0x50] sm:$0xff]  }
  0xe7   :  { %v198_v33 = vpop.f32.mrf.mxu0 }
  0xe8   :  { %v199_v34 = vadd.f32 %v198_v33, %v79_v30  ;;  %1381 = vtanh.f32 %v197_v32  ;;  %v1374_v30 = vld [vmem:[%s1895_s12 + $0x18] sm:$0xff]   ;;  %v1376_v32 = vld [vmem:[%s1895_s12 + $0x10] sm:$0xff]   ;;  %v1377_v33 = vld [vmem:[%s1895_s12 + $0x48] sm:$0xff]  }
  0xe9   :  { %v200_v35 = vpop.f32.mrf.mxu0 }
  0xea   :  { %1383 = vtanh.f32 %v199_v34  ;;  %v1378_v34 = vld [vmem:[%s1895_s12 + $0x8] sm:$0xff]   ;;  %v1379_v35 = vld [vmem:[%s1895_s12 + $0x40] sm:$0xff]  }
  0xeb   :  { %v201_v36 = vpop.f32.mrf.mxu0 }
  0xec   :  { %v1380_v36 = vld [vmem:[%s1895_s12] sm:$0xff]  }
  0xf5   :  { %v1382_v37 = vpop.eup %1381 }
  0xf6   :  { %v205_v40 = vpack.c.bf16 %v1382_v37, %v1382_v37  ;;  %v1146_v37 = vld [vmem:[#allocation2] ss:$0 sm:$0xff] }
  0xf7   :  { %v1384_v38 = vpop.eup %1383 }
  0xf8   :  { %v206_v39 = vpack.c.bf16 %v1384_v38, %v1384_v38 }
  0xfa   :  { %443 = vmatprep.mubr.bf16.mxu1 %v206_v39 }
  0xfb   :  { %444 = vmatmul.mubr.bf16.vlgmr.msra.gmra.mxu1 %v205_v40  ;;  %v671_v40 = vld [vmem:[%s1894_s11] sm:$0x3] }
  0xfc   :  { %1197 = vmatpush3.bf16.msra.mxu1 %v1366_v20  ;;  %v676_v41 = vrot.slane %v671_v40, %v1761_v26  ;;  %v680_v42 = vrot.slane %v671_v40, %v1766_v28 }
  0xfd   :  { %1198 = vmatprep.subr.bf16.mxu1 %v1367_v21 }
 0x100   :  { %1199 = vmatpush3.bf16.msra.mxu1 %v1368_v22 }
 0x101   :  { %1200 = vmatprep.subr.bf16.mxu1 %v1369_v23 }
 0x104   :  { %1201 = vmatpush3.bf16.msra.mxu1 %v1370_v24 }
 0x105   :  { %1202 = vmatprep.subr.bf16.mxu1 %v1371_v25 }
 0x108   :  { %1203 = vmatpush3.bf16.msra.mxu1 %v1372_v27 }
 0x109   :  { %1204 = vmatprep.subr.bf16.mxu1 %v1373_v29 }
 0x10c   :  { %1205 = vmatpush3.bf16.msra.mxu1 %v1374_v30 }
 0x10d   :  { %1206 = vmatprep.subr.bf16.mxu1 %v1375_v31 }
 0x110   :  { %v597_v47 = vpop.f32.mrf.mxu0  ;;  %1207 = vmatpush3.bf16.msra.mxu1 %v1376_v32 }
 0x111   :  { %v598_v4 = vadd.f32 %v597_v47, %v476_v3  ;;  %1208 = vmatprep.subr.bf16.mxu1 %v1377_v33 }
 0x112   :  { %v599_v48 = vpop.f32.mrf.mxu0 }
 0x113   :  { %v600_v9 = vadd.f32 %v599_v48, %v480_v5 }
 0x114   :  { %v601_v51 = vpop.f32.mrf.mxu0  ;;  %1209 = vmatpush3.bf16.msra.mxu1 %v1378_v34 }
 0x115   :  { %1210 = vmatprep.subr.bf16.mxu1 %v1379_v35 }
 0x116   :  { %v602_v52 = vpop.f32.mrf.mxu0 }
 0x118   :  { %1211 = vmatpush3.bf16.msra.mxu1 %v1380_v36 }
 0x1bb   :  { %v445_v60 = vpop.f32.mrf.mxu1 }
 0x1bc   :  { %v446_v61 = vadd.f32 %v445_v60, %v244_v58 }
 0x1bd   :  { %v447_v62 = vpop.f32.mrf.mxu1 }
 0x1be   :  { %1385 = vtanh.f32 %v446_v61  ;;  %v448_v63 = vadd.f32 %v447_v62, %v248_v59 }
 0x1bf   :  { %v449_v0 = vpop.f32.mrf.mxu1 }
 0x1c0   :  { %1387 = vtanh.f32 %v448_v63 }
 0x1c1   :  { %v450_v1 = vpop.f32.mrf.mxu1 }
 0x1cb   :  { %v1386_v7 = vpop.eup %1385 }
 0x1cc   :  { %v604_v8 = vmul.f32 %v1386_v7, %v598_v4 }
 0x1cd   :  { %v1388_v12 = vpop.eup %1387 }
 0x1ce   :  { %v605_v13 = vmul.f32 %v1388_v12, %v600_v9  ;;  %v618_v15 = vmul.f32 %v611_v10, %v604_v8  ;;  %v637_v17 = vpack.c.bf16 %v604_v8, %v604_v8 }
 0x1d0   :  { %v638_v14 = vpack.c.bf16 %v605_v13, %v605_v13  ;;  %v619_v16 = vmul.f32 %v615_v11, %v605_v13 }
 0x1d2   :  { %875 = vmatprep.mubr.bf16.mxu0 %v638_v14  ;;  %v620_v18 = vadd.f32 %v619_v16, %v618_v15 }
 0x1d3   :  { %876 = vmatmul.mubr.bf16.vlgmr.msra.gmra.mxu0 %v637_v17 }
 0x1d4   :  { %621 = vadd.xlane.f32.xlu0 %v620_v18 }
 0x25d   :  { %v622_v38 = vpop.xlane.xlu0 %621 }
 0x25e   :  { %v630_v39 = vadd.f32 %v1146_v37, %v622_v38 }
 0x260   :  { %633 = vperm.xlu0 %1220, %v630_v39  }
 0x293   :  { %v877_v43 = vpop.f32.mrf.mxu0 }
 0x294   :  { %v878_v44 = vadd.f32 %v877_v43, %v676_v41 }
 0x295   :  { %v879_v45 = vpop.f32.mrf.mxu0 }
 0x296   :  { %v880_v46 = vadd.f32 %v879_v45, %v680_v42  ;;  %1389 = vtanh.f32 %v878_v44 }
 0x297   :  { %v881_v47 = vpop.f32.mrf.mxu0 }
 0x298   :  { %1391 = vtanh.f32 %v880_v46 }
 0x299   :  { %v882_v48 = vpop.f32.mrf.mxu0 }
 0x2a3   :  { %v1390_v49 = vpop.eup %1389 }
 0x2a4   :  { %v886_v52 = vpack.c.bf16 %v1390_v49, %v1390_v49 }
 0x2a5   :  { %v1392_v50 = vpop.eup %1391 }
 0x2a6   :  { %v887_v51 = vpack.c.bf16 %v1392_v50, %v1392_v50 }
 0x2a8   :  { %1055 = vmatprep.mubr.bf16.mxu1 %v887_v51 }
 0x2a9   :  { %1056 = vmatmul.mubr.bf16.vlgmr.msra.gmra.mxu1 %v886_v52 }
 0x2db   :  { %v634_v53 = vpop.permute.xlu0 %633 }
 0x2dc   :  { %636 = vst [vmem:[%s1898_s15] sm:$0xff] %v634_v53 }
 0x369   :  { %v1212_v26 = vpop.f32.mrf.mxu1 }
 0x36b   :  { %v1213_v28 = vpop.f32.mrf.mxu1 }
 0x36c   :  { %v1214_v55 = vadd.f32 %v1213_v28, %v1212_v26 }
 0x36d   :  { %v1215_v56 = vpop.f32.mrf.mxu1 }
 0x36e   :  { %v1058_v57 = vadd.f32 %v1214_v55, %v1179_v54 }
 0x36f   :  { %v1216_v58 = vpop.f32.mrf.mxu1 }
 0x370   :  { %1063 = vst [vmem:[#allocation3] sm:$0xff] %v1058_v57 }
 0x371   :  { %1404 = shalt.err (!%p1401_p4)
}
 0x372   :  { %1073 = dma.vmem_to_hbm [thread:$0]  %s1071_s25, 128, %s1897_s14, [#allocation4]  }
 0x373   :  { %1413 = dma.done.wait [#allocation4], 128  }
 0x374   :  { %1414 = vsyncadd [#allocation4], 4294967168 }
 0x375   :  { %1081 = vsyncpa [#allocation4], 1 }

</bundles_post_ra>
